<compile_context>
chip_gen: v7x
topology: tpu7x:2x2x1
jax: 0.10.0
libtpu: 0.0.40
codegen_flags: <defaults>
</compile_context>

<pallas_src>
import math

import jax
import jax.numpy as jnp
from jax.experimental import pallas as pl
from jax.experimental.pallas import tpu as pltpu


# ----------------------------- in-kernel helpers -----------------------------

def _erf_poly(x):
    # Abramowitz & Stegun 7.1.26 polynomial, |err| < 1.5e-7 (f32-level).
    # Reproduces the exact (erf-based) nn.GELU with only exp/abs/arithmetic,
    # which always lower in Mosaic.
    p = 0.3275911
    a1, a2, a3, a4, a5 = 0.254829592, -0.284496736, 1.421413741, -1.453152027, 1.061405429
    s = jnp.where(x < 0.0, -1.0, 1.0)
    ax = jnp.abs(x)
    t = 1.0 / (1.0 + p * ax)
    poly = ((((a5 * t + a4) * t + a3) * t + a2) * t + a1) * t
    return s * (1.0 - poly * jnp.exp(-ax * ax))


def _gelu_exact(x):
    # PyTorch nn.GELU() default = exact erf formulation.
    return 0.5 * x * (1.0 + _erf_poly(x * (1.0 / math.sqrt(2.0))))


# --------------------------------- kernel ------------------------------------

def mlp_kernel(x_ref, w1_ref, b1_ref, w2_ref, b2_ref, o_ref):
    # x_ref: (tm, dim)   w1: (dim, hidden)  b1: (1, hidden)
    # w2: (hidden, d_pad)  b2: (1, d_pad)   o_ref: (tm, d_pad)
    x = x_ref[...].astype(jnp.float32)
    h = jnp.dot(x, w1_ref[...], preferred_element_type=jnp.float32) + b1_ref[...]
    h = _gelu_exact(h)
    y = jnp.dot(h, w2_ref[...], preferred_element_type=jnp.float32) + b2_ref[...]
    o_ref[...] = y.astype(o_ref.dtype)


# --------------------------------- wrapper -----------------------------------

def _round_up(v, m):
    return ((v + m - 1) // m) * m


def mlp_forward(x, params, *, row_tile_target=512):
    w1, b1, w2, b2 = params["w1"], params["b1"], params["w2"], params["b2"]
    dim, hidden = w1.shape
    assert x.shape[-1] == dim

    lead = x.shape[:-1]
    m = 1
    for s in lead:
        m *= s
    x2 = x.reshape(m, dim)

    # Row tile: multiple of 8 sublanes, fat enough to amortize per-step
    # overhead, but leaves >= 2 grid steps when possible (v7x has 2 TCs/chip).
    tm = min(row_tile_target, _round_up(m, 8))
    if m > 8:
        tm = min(tm, _round_up((m + 1) // 2, 8))
    tm = max(tm, 8)
    m_pad = _round_up(m, tm)
    if m_pad != m:
        x2 = jnp.pad(x2, ((0, m_pad - m), (0, 0)))

    # Lane-dense output: pad the 2nd Linear's output columns to a 128 multiple
    # with zeros (padded columns produce exact zeros, sliced off below).
    d_pad = _round_up(dim, 128)
    if d_pad != dim:
        w2p = jnp.pad(w2, ((0, 0), (0, d_pad - dim)))
        b2p = jnp.pad(b2, ((0, 0), (0, d_pad - dim)))
    else:
        w2p, b2p = w2, b2

    grid = (m_pad // tm,)
    flops = 2 * m_pad * dim * hidden + 2 * m_pad * hidden * d_pad + 8 * m_pad * hidden
    bytes_accessed = 4 * (x2.size + m_pad * d_pad
                          + w1.size + b1.size + w2p.size + b2p.size)

    out = pl.pallas_call(
        mlp_kernel,
        out_shape=jax.ShapeDtypeStruct((m_pad, d_pad), x.dtype),
        grid=grid,
        in_specs=[
            pl.BlockSpec((tm, dim), lambda i: (i, 0)),       # activations, tiled rows
            pl.BlockSpec((dim, hidden), lambda i: (0, 0)),   # w1 (VMEM-resident)
            pl.BlockSpec((1, hidden), lambda i: (0, 0)),     # b1
            pl.BlockSpec((hidden, d_pad), lambda i: (0, 0)), # w2 (lane-padded)
            pl.BlockSpec((1, d_pad), lambda i: (0, 0)),      # b2 (lane-padded)
        ],
        out_specs=pl.BlockSpec((tm, d_pad), lambda i: (i, 0)),
        compiler_params=pltpu.CompilerParams(
            dimension_semantics=("parallel",)),
        cost_estimate=pl.CostEstimate(
            flops=flops,
            transcendentals=m_pad * hidden,     # one exp per GELU element
            bytes_accessed=bytes_accessed),
    )(x2, w1, b1, w2p, b2p)

    return out[:m, :dim].reshape(*lead, dim)


# ---------------------- deterministic parameter init -------------------------

def init_params(key, dim, hidden_dim):
    # Weights stored pre-transposed as (in_features, out_features), i.e.
    # y = x @ W + b  (equivalent to PyTorch nn.Linear's x @ W_pt.T + b).
    k1, k2, k3 = jax.random.split(key, 3)

    def w(k, shape, scale=0.05):
        return (scale * jax.random.normal(k, shape)).astype(jnp.float32)

    return {
        "w1": w(k1, (dim, hidden_dim)),
        "b1": w(k2, (1, hidden_dim), 0.02),
        "w2": w(k3, (hidden_dim, dim)),
        "b2": jnp.zeros((1, dim), jnp.float32),
    }


# ---------------------------- pure-JAX reference -----------------------------

def reference_forward(x, p):
    h = jax.nn.gelu(x @ p["w1"] + p["b1"][0], approximate=False)
    return h @ p["w2"] + p["b2"][0]


# ----------------------------------- main -------------------------------------

if __name__ == "__main__":
    dim, hidden_dim = 32, 64
    B, N = 2, 8

    key = jax.random.PRNGKey(0)
    kx, kp = jax.random.split(key)
    x = jax.random.normal(kx, (B, N, dim), dtype=jnp.float32)
    params = init_params(kp, dim, hidden_dim)

    out = mlp_forward(x, params)
    out = jax.block_until_ready(out)

    ref = reference_forward(x, params)
    assert out.shape == x.shape
    assert bool(jnp.all(jnp.isfinite(out)))
    assert bool(jnp.allclose(out, ref, atol=1e-3, rtol=1e-3)), "mismatch vs JAX reference"

    print("KERNEL_OK")
</pallas_src>

<mosaic_0001>
module attributes {stable_mosaic.version = 11 : i64} {
  func.func @mlp_kernel(%arg0: i32, %arg1: memref<8x32xf32, #tpu.memory_space<vmem>>, %arg2: memref<32x64xf32, #tpu.memory_space<vmem>>, %arg3: memref<1x64xf32, #tpu.memory_space<vmem>>, %arg4: memref<64x128xf32, #tpu.memory_space<vmem>>, %arg5: memref<1x128xf32, #tpu.memory_space<vmem>>, %arg6: memref<8x128xf32, #tpu.memory_space<vmem>>) attributes {dimension_semantics = [#tpu.dimension_semantics<parallel>], iteration_bounds = array<i64: 2>, scalar_prefetch = 0 : i64, scratch_operands = 0 : i64, tpu.core_type = #tpu.core_type<tc>, window_params = [{transform_indices = @transform_0, window_bounds = array<i64: 8, 32>}, {pipeline_mode = #tpu.pipeline_mode<synchronous>, transform_indices = @transform_1, window_bounds = array<i64: 32, 64>}, {pipeline_mode = #tpu.pipeline_mode<synchronous>, transform_indices = @transform_2, window_bounds = array<i64: 1, 64>}, {pipeline_mode = #tpu.pipeline_mode<synchronous>, transform_indices = @transform_3, window_bounds = array<i64: 64, 128>}, {pipeline_mode = #tpu.pipeline_mode<synchronous>, transform_indices = @transform_4, window_bounds = array<i64: 1, 128>}, {transform_indices = @transform_5, window_bounds = array<i64: 8, 128>}]} {
    %c0 = arith.constant 0 : index
    %c0_0 = arith.constant 0 : index
    %0 = vector.load %arg1[%c0, %c0_0] : memref<8x32xf32, #tpu.memory_space<vmem>>, vector<8x32xf32>
    %c0_1 = arith.constant 0 : index
    %c0_2 = arith.constant 0 : index
    %1 = vector.load %arg2[%c0_1, %c0_2] : memref<32x64xf32, #tpu.memory_space<vmem>>, vector<32x64xf32>
    %cst = arith.constant dense<0.000000e+00> : vector<8x64xf32>
    %2 = tpu.matmul %0, %1, %cst {dimension_numbers = #tpu.dot_dimension_numbers<[1], [0], [0], [1], [0, 0, 1, 1], [], []>} : vector<8x32xf32>, vector<32x64xf32>, vector<8x64xf32> -> vector<8x64xf32>
    %c0_3 = arith.constant 0 : index
    %c0_4 = arith.constant 0 : index
    %3 = vector.load %arg3[%c0_3, %c0_4] : memref<1x64xf32, #tpu.memory_space<vmem>>, vector<1x64xf32>
    %4 = vector.broadcast %3 : vector<1x64xf32> to vector<8x64xf32>
    %5 = arith.addf %2, %4 : vector<8x64xf32>
    %cst_5 = arith.constant 5.000000e-01 : f32
    %6 = vector.broadcast %cst_5 : f32 to vector<8x64xf32>
    %7 = arith.mulf %6, %5 : vector<8x64xf32>
    %cst_6 = arith.constant 0.707106769 : f32
    %8 = vector.broadcast %cst_6 : f32 to vector<8x64xf32>
    %9 = arith.mulf %5, %8 : vector<8x64xf32>
    %cst_7 = arith.constant 0.000000e+00 : f32
    %10 = vector.broadcast %cst_7 : f32 to vector<8x64xf32>
    %11 = arith.cmpf olt, %9, %10 : vector<8x64xf32>
    %cst_8 = arith.constant -1.000000e+00 : f32
    %cst_9 = arith.constant 1.000000e+00 : f32
    %12 = vector.broadcast %cst_8 : f32 to vector<8x64xf32>
    %13 = vector.broadcast %cst_9 : f32 to vector<8x64xf32>
    %14 = arith.select %11, %12, %13 : vector<8x64xi1>, vector<8x64xf32>
    %15 = math.absf %9 : vector<8x64xf32>
    %cst_10 = arith.constant 0.327591091 : f32
    %16 = vector.broadcast %cst_10 : f32 to vector<8x64xf32>
    %17 = arith.mulf %16, %15 : vector<8x64xf32>
    %cst_11 = arith.constant 1.000000e+00 : f32
    %18 = vector.broadcast %cst_11 : f32 to vector<8x64xf32>
    %19 = arith.addf %18, %17 : vector<8x64xf32>
    %cst_12 = arith.constant 1.000000e+00 : f32
    %20 = vector.broadcast %cst_12 : f32 to vector<8x64xf32>
    %21 = arith.divf %20, %19 : vector<8x64xf32>
    %cst_13 = arith.constant 1.06140542 : f32
    %22 = vector.broadcast %cst_13 : f32 to vector<8x64xf32>
    %23 = arith.mulf %22, %21 : vector<8x64xf32>
    %cst_14 = arith.constant -1.45315206 : f32
    %24 = vector.broadcast %cst_14 : f32 to vector<8x64xf32>
    %25 = arith.addf %23, %24 : vector<8x64xf32>
    %26 = arith.mulf %25, %21 : vector<8x64xf32>
    %cst_15 = arith.constant 1.42141378 : f32
    %27 = vector.broadcast %cst_15 : f32 to vector<8x64xf32>
    %28 = arith.addf %26, %27 : vector<8x64xf32>
    %29 = arith.mulf %28, %21 : vector<8x64xf32>
    %cst_16 = arith.constant -0.284496725 : f32
    %30 = vector.broadcast %cst_16 : f32 to vector<8x64xf32>
    %31 = arith.addf %29, %30 : vector<8x64xf32>
    %32 = arith.mulf %31, %21 : vector<8x64xf32>
    %cst_17 = arith.constant 0.254829586 : f32
    %33 = vector.broadcast %cst_17 : f32 to vector<8x64xf32>
    %34 = arith.addf %32, %33 : vector<8x64xf32>
    %35 = arith.mulf %34, %21 : vector<8x64xf32>
    %cst_18 = arith.constant 0.000000e+00 : f32
    %36 = vector.broadcast %cst_18 : f32 to vector<8x64xf32>
    %37 = arith.subf %36, %15 : vector<8x64xf32>
    %38 = arith.mulf %37, %15 : vector<8x64xf32>
    %39 = math.exp %38 : vector<8x64xf32>
    %40 = arith.mulf %35, %39 : vector<8x64xf32>
    %cst_19 = arith.constant 1.000000e+00 : f32
    %41 = vector.broadcast %cst_19 : f32 to vector<8x64xf32>
    %42 = arith.subf %41, %40 : vector<8x64xf32>
    %43 = arith.mulf %14, %42 : vector<8x64xf32>
    %cst_20 = arith.constant 1.000000e+00 : f32
    %44 = vector.broadcast %cst_20 : f32 to vector<8x64xf32>
    %45 = arith.addf %44, %43 : vector<8x64xf32>
    %46 = arith.mulf %7, %45 : vector<8x64xf32>
    %c0_21 = arith.constant 0 : index
    %c0_22 = arith.constant 0 : index
    %47 = vector.load %arg4[%c0_21, %c0_22] : memref<64x128xf32, #tpu.memory_space<vmem>>, vector<64x128xf32>
    %cst_23 = arith.constant dense<0.000000e+00> : vector<8x128xf32>
    %48 = tpu.matmul %46, %47, %cst_23 {dimension_numbers = #tpu.dot_dimension_numbers<[1], [0], [0], [1], [0, 0, 1, 1], [], []>} : vector<8x64xf32>, vector<64x128xf32>, vector<8x128xf32> -> vector<8x128xf32>
    %c0_24 = arith.constant 0 : index
    %c0_25 = arith.constant 0 : index
    %49 = vector.load %arg5[%c0_24, %c0_25] : memref<1x128xf32, #tpu.memory_space<vmem>>, vector<1x128xf32>
    %50 = vector.broadcast %49 : vector<1x128xf32> to vector<8x128xf32>
    %51 = arith.addf %48, %50 : vector<8x128xf32>
    %c0_26 = arith.constant 0 : index
    %c0_27 = arith.constant 0 : index
    %52 = vector.load %arg6[%c0_26, %c0_27] : memref<8x128xf32, #tpu.memory_space<vmem>>, vector<8x128xf32>
    tpu.vector_store %arg6[%c0_26, %c0_27], %51 {strides = array<i32>} : memref<8x128xf32, #tpu.memory_space<vmem>>, vector<8x128xf32>,
    return
  }
  func.func @transform_0(%arg0: i32) -> (i32, i32) {
    %c0_i32 = arith.constant 0 : i32
    %c0_i32_0 = arith.constant 0 : i32
    return %arg0, %c0_i32 : i32, i32
  }
  func.func @transform_1(%arg0: i32) -> (i32, i32) {
    %c0_i32 = arith.constant 0 : i32
    %c0_i32_0 = arith.constant 0 : i32
    %c0_i32_1 = arith.constant 0 : i32
    return %c0_i32, %c0_i32_0 : i32, i32
  }
  func.func @transform_2(%arg0: i32) -> (i32, i32) {
    %c0_i32 = arith.constant 0 : i32
    %c0_i32_0 = arith.constant 0 : i32
    %c0_i32_1 = arith.constant 0 : i32
    return %c0_i32, %c0_i32_0 : i32, i32
  }
  func.func @transform_3(%arg0: i32) -> (i32, i32) {
    %c0_i32 = arith.constant 0 : i32
    %c0_i32_0 = arith.constant 0 : i32
    %c0_i32_1 = arith.constant 0 : i32
    return %c0_i32, %c0_i32_0 : i32, i32
  }
  func.func @transform_4(%arg0: i32) -> (i32, i32) {
    %c0_i32 = arith.constant 0 : i32
    %c0_i32_0 = arith.constant 0 : i32
    %c0_i32_1 = arith.constant 0 : i32
    return %c0_i32, %c0_i32_0 : i32, i32
  }
  func.func @transform_5(%arg0: i32) -> (i32, i32) {
    %c0_i32 = arith.constant 0 : i32
    %c0_i32_0 = arith.constant 0 : i32
    return %arg0, %c0_i32 : i32, i32
  }
}

</mosaic_0001>

<bundles_post_ra>
// kernel: tpu_custom_call.1
= control target key start
LH: loop header
LB: loop body
LE: loop exit
PB: predicated region body
PF: predicated region fallthrough
CT: control target
= control target key end

     0   :  { %10 = vsyncpa [#allocation3], 0  ;;  %s1171_s0 = inlined_call_operand.hbm [shape: f32[16,32], index: 0, kind: input, shape index: {}]   ;;  %s1172_s1 = inlined_call_operand.hbm [shape: f32[32,64], index: 1, kind: input, shape index: {}]   ;;  %s1173_s2 = inlined_call_operand.vmem [shape: f32[1,64], index: 2, kind: input, shape index: {}]   ;;  %s1174_s3 = inlined_call_operand.hbm [shape: f32[64,128], index: 3, kind: input, shape index: {}]   ;;  %s1175_s4 = inlined_call_operand.vmem [shape: f32[1,128], index: 4, kind: input, shape index: {}]   ;;  %s1176_s5 = inlined_call_operand.hbm [shape: f32[16,128], index: 5, kind: output, shape index: {}]  }
   0x1   :  { %12 = vsyncpa [#allocation3 + $0x1], 0 }
   0x2   :  { %13 = vsyncpa [#allocation6], 0 }
   0x3   :  { %14 = vsyncpa [#allocation4], 0 }
   0x4   :  { %16 = vsyncpa [#allocation4 + $0x1], 0  ;;  %s932_s18 = smov 0   ;;  %s934_s19 = smov 0  }
   0x5   :  { %s936_s20 = smov 0   ;;  %s938_s21 = smov 0  }
   0x6 LB: > { %s953_s22 = sadd.s32 4294967295, %s890_s21   ;;  %s575_s23 = sadd.s32 4294967294, %s890_s21   ;;  %s890_s21 = sphi %s938_s21, %s1196_s21   ;;  %s886_s20 = sphi %s936_s20, %s1195_s20   ;;  %s882_s19 = sphi %s934_s19, %s1194_s19   ;;  %s878_s18 = sphi %s932_s18, %s1193_s18  }
   0x7   : > { %p42_p0 = scmp.ne.s32.totalorder %s882_s19, %s878_s18  ;;  %p1177_p1 = scmp.eq.s32.totalorder %s953_s22, 0 }
   0x8   : > { %p156_p3 = scmp.eq.s32.totalorder %s575_s23, 1  ;;  %p576_p5 = scmp.ge.s32.totalorder %s890_s21, 1 }
   0x9   : > { %p962_p4 = por %p1177_p1, %p42_p0  ;;  %p163_p7 = scmp.lt.s32.totalorder %s890_s21, 3 }
   0xa   : > { %p967_p6 = por %p156_p3, %p42_p0  ;;  %s892_s27 = smov [#allocation5]  }
   0xb   : > { %s1180_s24 = scalar_select %p962_p4, 1, 0 }
   0xc   : > { %s1181_s25 = scalar_select %p967_p6, 1, 0 }
   0xd   : > { %p972_p8 = pnand %p576_p5, %p163_p7  ;;  %s175_s28 = sshll.u32 %s892_s27, 4  ;;  %s976_s28 = int_to_ptr.vmem [resolvable:$true] %s175_s28 }
   0xe   : > { %s893_s30 = smov [#allocation7]   ;;  %s734_s9 = scalar_lea.hbm %s1172_s1, 512 }
   0xf   : > { %p669_p9 = pneg %p972_p8  ;;  %s191_s6 = sshll.u32 %s893_s30, 4  ;;  %s987_s6 = int_to_ptr.vmem [resolvable:$true] %s191_s6 }
  0x10   : > { %p735_p12 = scmp.ne.s32.totalorder %s1172_s1, %s734_s9  ;;  %p741_p5 = scmp.lt.u32.totalorder %s734_s9, %s1172_s1 }
  0x11   : > { %p983_p11 = pnand %p669_p9, %p1177_p1 }
  0x13   : > { %p736_p13 = pneg %p983_p11 }
  0x15   : > { %p737_p0 = pnand %p736_p13, %p735_p12 }
  0x17   : > { %p738_p3 = pneg %p737_p0 }
  0x19   : > { %p743_p7 = pnand %p741_p5, %p738_p3 }
  0x1b   : > { %746 = shalt.err (!%p743_p7)
}
  0x1c   : > { %s747_s14 = scalar_lea.vmem %s976_s28, 512  ;;  %p755_p2 = scmp.lt.s32.totalorder %s976_s28, %s976_s28 }
  0x1d   : > { %p748_p9 = scmp.ne.s32.totalorder %s976_s28, %s747_s14  ;;  %p756_p12 = scmp.lt.s32.totalorder %s747_s14, %s747_s14 }
  0x1f   : > { %p750_p10 = pnand %p748_p9, %p736_p13  ;;  %p757_p0 = por %p756_p12, %p755_p2 }
  0x21   : > { %p751_p1 = pneg %p750_p10 }
  0x23   : > { %p758_p6 = pnand %p757_p0, %p751_p1 }
  0x25   : > { %761 = shalt.err (!%p758_p6)
}
  0x26   : > { %s894_s15 = smov 128   ;;  %s895_s16 = smov 8  }
  0x27   : > { %672 = dma.hbm_to_vmem [thread:$0]  (!%p983_p11), %s1172_s1, 512, %s976_s28, [#allocation6], %s894_s15, %s894_s15, %s895_s16  }
  0x28   : > { %s762_s7 = scalar_lea.hbm %s1174_s3, 1024 }
  0x29   : > { %p763_p2 = scmp.ne.s32.totalorder %s1174_s3, %s762_s7  ;;  %p769_p10 = scmp.lt.u32.totalorder %s762_s7, %s1174_s3 }
  0x2b   : > { %p765_p1 = pnand %p763_p2, %p736_p13 }
  0x2d   : > { %p766_p6 = pneg %p765_p1 }
  0x2f   : > { %p771_p3 = pnand %p769_p10, %p766_p6 }
  0x31   : > { %774 = shalt.err (!%p771_p3)
}
  0x32   : > { %s775_s28 = scalar_lea.vmem %s987_s6, 1024  ;;  %p783_p12 = scmp.lt.s32.totalorder %s987_s6, %s987_s6 }
  0x33   : > { %p776_p5 = scmp.ne.s32.totalorder %s987_s6, %s775_s28  ;;  %p784_p0 = scmp.lt.s32.totalorder %s775_s28, %s775_s28 }
  0x35   : > { %p778_p7 = pnand %p776_p5, %p736_p13  ;;  %p785_p2 = por %p784_p0, %p783_p12 }
  0x37   : > { %p779_p9 = pneg %p778_p7 }
  0x39   : > { %p786_p1 = pnand %p785_p2, %p779_p9 }
  0x3b   : > { %789 = shalt.err (!%p786_p1)
}
  0x3c   : > { %675 = dma.hbm_to_vmem [thread:$0]  (!%p983_p11), %s1174_s3, 1024, %s987_s6, [#allocation6], %s894_s15, %s894_s15, %s895_s16  }
  0x3d   : > { %s1042_s14 = sadd.s32 1, %s890_s21   ;;  %s29_s29 = sadd.s32 1, %s886_s20 }
  0x3e   : > { %s26_s17 = ssub.s32 %s890_s21, %s1042_s14  ;;  %p36_p13 = scmp.ne.s32.totalorder %s886_s20, %s882_s19 }
  0x3f   : > { %p27_p6 = scmp.eq.s32.totalorder %s26_s17, 0  ;;  %p37_p10 = scmp.eq.s32.totalorder %s890_s21, 0 }
  0x40   : > { %p1184_p3 = scmp.eq.s32.totalorder %s953_s22, 1  ;;  %p686_p7 = scmp.lt.s32.totalorder %s890_s21, 2 }
  0x41   : > { %s1058_s27 = scalar_select %p27_p6, %s886_s20, %s29_s29  }
  0x42   : > { %p1052_p5 = por %p1184_p3, %p36_p13  ;;  %p38_p9 = por %p37_p10, %p36_p13 }
  0x43   : > { %s208_s30 = sand.u32 1, %s886_s20   ;;  %s581_s6 = sshll.u32 %s890_s21, 7 }
  0x44   : > { %s1185_s23 = scalar_select %p1052_p5, 1, 0 }
  0x45   : > { %s580_s7 = sshll.u32 %s208_s30, 3  ;;  %s1065_s8 = scalar_lea.hbm %s1171_s0, %s581_s6 }
  0x46   : > { %s212_s9 = scalar_lea.vmem [#allocation2], %s580_s7  ;;  %p1069_p11 = pnand %p686_p7, %p38_p9 }
  0x47   : > { %s219_s10 = sshll.u32 %s212_s9, 4  ;;  %s209_s28 = scalar_lea.sflag [#allocation3], %s208_s30  ;;  %s1067_s10 = int_to_ptr.vmem [resolvable:$true] %s219_s10 }
  0x48   : > { %s790_s12 = scalar_lea.hbm %s1065_s8, 128  ;;  %p792_p0 = pneg %p1069_p11 }
  0x49   : > { %p791_p12 = scmp.ne.s32.totalorder %s1065_s8, %s790_s12  ;;  %s795_s17 = scalar_lea.hbm %s1171_s0, 256 }
  0x4a   : > { %p796_p13 = scmp.lt.u32.totalorder %s1065_s8, %s1171_s0  ;;  %p797_p6 = scmp.lt.u32.totalorder %s795_s17, %s790_s12 }
  0x4b   : > { %p793_p2 = pnand %p792_p0, %p791_p12  ;;  %p799_p3 = scmp.lt.u32.totalorder %s790_s12, %s1065_s8 }
  0x4c   : > { %p798_p10 = por %p797_p6, %p796_p13 }
  0x4d   : > { %p794_p1 = pneg %p793_p2 }
  0x4e   : > { %p800_p7 = por %p799_p3, %p798_p10 }
  0x50   : > { %p801_p9 = pnand %p800_p7, %p794_p1 }
  0x52   : > { %804 = shalt.err (!%p801_p9)
}
  0x53   : > { %s805_s30 = scalar_lea.vmem %s1067_s10, 128  ;;  %s896_s15 = smov [#allocation2]  }
  0x54   : > { %p806_p12 = scmp.ne.s32.totalorder %s1067_s10, %s805_s30  ;;  %s810_s16 = sshll.u32 %s896_s15, 4  ;;  %s811_s16 = int_to_ptr.vmem [resolvable:$false] %s810_s16 }
  0x55   : > { %s812_s9 = scalar_lea.vmem %s811_s16, 256  ;;  %p813_p4 = scmp.lt.s32.totalorder %s1067_s10, %s811_s16 }
  0x56   : > { %p808_p2 = pnand %p806_p12, %p792_p0  ;;  %p814_p13 = scmp.lt.s32.totalorder %s812_s9, %s805_s30 }
  0x58   : > { %p809_p5 = pneg %p808_p2  ;;  %p815_p6 = por %p814_p13, %p813_p4 }
  0x5a   : > { %p816_p10 = pnand %p815_p6, %p809_p5 }
  0x5c   : > { %819 = shalt.err (!%p816_p10)
}
  0x5d   : > { %679 = dma.hbm_to_vmem [thread:$0]  (!%p1069_p11), %s1065_s8, 128, %s1067_s10, %s209_s28  }
  0x5e   : > { %228 = sbr.rel (%p972_p8) target bundleno = 604 (0x25c), region = 40  ;;  %s1101_s12 = sand.u32 (!%p972_p8), 1, %s882_s19  }
  0x5f   : > { %s583_s13 = sshll.u32 (!%p972_p8), %s1101_s12, 3  ;;  %s231_s29 = scalar_lea.sflag (!%p972_p8), [#allocation3], %s1101_s12 }
  0x60   : > { %s234_s17 = scalar_lea.vmem (!%p972_p8), [#allocation2], %s583_s13  ;;  %p1187_p4 = scmp.ne.s32.totalorder (!%p972_p8), %s1180_s24, 0 }
  0x65   : > { %865 = dma.done.wait (%p1187_p4), %s231_s29, 128  }
  0x66   : > { %867 = vsyncadd (%p1187_p4), %s231_s29, 4294967168  ;;  %p1188_p5 = scmp.eq.s32.totalorder %s953_s22, 0 }
  0x68   : > { %869 = dma.done.wait (%p1188_p5), [#allocation6], 1536   ;;  %p1189_p8 = pmov %p1188_p5 }
  0x69   : > { %v897_v0 = vmov 0.0|0.0   ;;  %vm898_vm0 = vmmov 0   ;;  %v899_v1 = vmov 0.0   ;;  %v270_v2 = vld [vmem:[#allocation5] sm:$0xff]  ;;  %v271_v3 = vld [vmem:[#allocation5 + $0x8] sm:$0xff]  ;;  %v272_v4 = vld [vmem:[#allocation5 + $0x10] sm:$0xff] }
  0x6a   : > { %871 = vsyncadd (%p1189_p8), [#allocation6], 4294965760  ;;  %639 = vmatprep.subr.bf16.mxu0 %v897_v0  ;;  %617 = vmatprep.mubr.msk.f32.mxu0 %vm898_vm0, %v899_v1  ;;  %v640_v5 = vpack.c.bf16 %v271_v3, %v270_v2  ;;  %v273_v6 = vld [vmem:[#allocation5 + $0x18] sm:$0xff]  ;;  %vm281_vm1 = vcmask 261120   ;;  %v382_v9 = vld [vmem:[#allocation7] sm:$0xff]  ;;  %v900_v45 = vmov 1.0  }
  0x6b   : > { %645 = vmatprep.subr.bf16.mxu1 %v897_v0  ;;  %636 = vmatprep.mubr.msk.f32.mxu1 %vm898_vm0, %v899_v1  ;;  %v643_v7 = vpack.c.bf16 %v273_v6, %v272_v4  ;;  %v269_v8 = vld [vmem:[%s234_s17] sm:$0xff]  ;;  %v383_v10 = vld [vmem:[#allocation7 + $0x8] sm:$0xff]  ;;  %v386_v15 = vld [vmem:[#allocation7 + $0x20] sm:$0xff]  ;;  %vm397_vm3 = vcmask 523264   ;;  %s592_s11 = sshll.u32 %s953_s22, 7  ;;  %s268_s28 = scalar_lea.vmem [#allocation8], %s583_s13 }
  0x6c   : > { %641 = vmatpush3.bf16.msra.mxu0 %v640_v5  ;;  %v646_v11 = vpack.c.bf16 %v383_v10, %v382_v9  ;;  %v384_v12 = vld [vmem:[#allocation7 + $0x10] sm:$0xff]  ;;  %v385_v13 = vld [vmem:[#allocation7 + $0x18] sm:$0xff]  ;;  %v387_v16 = vld [vmem:[#allocation7 + $0x28] sm:$0xff]  ;;  %s486_s7 = sshll.u32 %s268_s28, 4  ;;  %s1127_s15 = scalar_lea.hbm %s1176_s5, %s592_s11  ;;  %s1129_s7 = int_to_ptr.vmem [resolvable:$true] %s486_s7 }
  0x6d   : > { %642 = vmatprep.subr.bf16.mxu0 %v897_v0  ;;  %v649_v14 = vpack.c.bf16 %v385_v13, %v384_v12  ;;  %v652_v17 = vpack.c.bf16 %v387_v16, %v386_v15  ;;  %v388_v18 = vld [vmem:[#allocation7 + $0x30] sm:$0xff]  ;;  %v389_v19 = vld [vmem:[#allocation7 + $0x38] sm:$0xff]  ;;  %s473_s16 = scalar_lea.sflag [#allocation4], %s1101_s12  ;;  %s820_s9 = scalar_lea.vmem %s1129_s7, 128 }
  0x6e   : > { %647 = vmatpush3.bf16.msra.mxu1 %v646_v11  ;;  %v655_v20 = vpack.c.bf16 %v389_v19, %v388_v18  ;;  %v587_v21 = vld [vmem:[%s1173_s2] ss:$0 sm:$0xff]  ;;  %p821_p11 = scmp.ne.s32.totalorder %s1129_s7, %s820_s9  ;;  %p1190_p0 = scmp.ne.s32.totalorder %s1185_s23, 0 }
  0x6f   : > { %648 = vmatprep.subr.bf16.mxu1 %v897_v0  ;;  %v589_v51 = vld [vmem:[%s1175_s4] ss:$0 sm:$0xff]  ;;  %s901_s22 = smov [#allocation8]  }
  0x70   : > { %644 = vmatpush3.bf16.msra.mxu0 %v643_v7  ;;  %p822_p1 = pnand %p821_p11, %p1190_p0  ;;  %s824_s13 = sshll.u32 %s901_s22, 4  ;;  %s825_s13 = int_to_ptr.vmem [resolvable:$false] %s824_s13 }
  0x71   : > { %s826_s29 = scalar_lea.vmem %s825_s13, 256  ;;  %p827_p7 = scmp.lt.s32.totalorder %s1129_s7, %s825_s13 }
  0x72   : > { %650 = vmatpush3.bf16.msra.mxu1 %v649_v14  ;;  %p823_p3 = pneg %p822_p1  ;;  %p828_p9 = scmp.lt.s32.totalorder %s826_s29, %s820_s9 }
  0x73   : > { %618 = vmatmul.mubr.msk.f32.vlgmr.msra.gmra.mrb[0].mxu0 %vm281_vm1, %v269_v8  ;;  %651 = vmatprep.subr.bf16.mxu1 %v897_v0 }
  0x74   : > { %p829_p12 = por %p828_p9, %p827_p7 }
  0x76   : > { %653 = vmatpush3.bf16.msra.mxu1 %v652_v17  ;;  %p830_p2 = pnand %p829_p12, %p823_p3 }
  0x77   : > { %654 = vmatprep.subr.bf16.mxu1 %v897_v0 }
  0x7a   : > { %656 = vmatpush3.bf16.msra.mxu1 %v655_v20 }
 0x146   : > { %v351_v22 = vpop.f32.mrb[0].mxu0 }
 0x147   : > { %v352_v23 = vadd.f32 %v587_v21, %v351_v22  ;;  %v619_v24 = vpop.f32.mrb[1].mxu0 }
 0x149   : > { %v356_v25 = vmul.f32 0.70710677, %v352_v23  ;;  %v355_v48 = vmul.f32 0.5, %v352_v23 }
 0x14b   : > { %v359_v26 = vand.u32 2147483647, %v356_v25  ;;  %vm357_vm2 = vcmp.lt.f32.partialorder %v356_v25, 0.0 }
 0x14c   : > { %v358_v46 = vsel %vm357_vm2, -1.0, %v900_v45 }
 0x14d   : > { %v360_v27 = vmul.f32 0.3275911, %v359_v26  ;;  %v373_v29 = vsub.f32 0.0, %v359_v26 }
 0x14f   : > { %v361_v28 = vadd.f32 1.0, %v360_v27  ;;  %v374_v31 = vmul.f32 %v373_v29, %v359_v26 }
 0x151   : > { %730 = vrcp.f32 %v361_v28  ;;  %v375_v34 = vmul.f32 1.442695, %v374_v31 }
 0x153   : > { %732 = vpow2.f32 %v375_v34 }
 0x15b   : > { %v731_v30 = vpop.eup %730 }
 0x15c   : > { %v364_v32 = vmul.f32 1.0614054, %v731_v30 }
 0x15d   : > { %v733_v42 = vpop.eup %732 }
 0x15e   : > { %v365_v33 = vadd.f32 -1.4531521, %v364_v32 }
 0x160   : > { %v366_v35 = vmul.f32 %v731_v30, %v365_v33 }
 0x162   : > { %v367_v36 = vadd.f32 1.4214138, %v366_v35 }
 0x164   : > { %v368_v37 = vmul.f32 %v731_v30, %v367_v36 }
 0x166   : > { %v369_v38 = vadd.f32 -0.28449672, %v368_v37 }
 0x168   : > { %v370_v39 = vmul.f32 %v731_v30, %v369_v38 }
 0x16a   : > { %v371_v40 = vadd.f32 0.2548296, %v370_v39 }
 0x16c   : > { %v372_v41 = vmul.f32 %v731_v30, %v371_v40 }
 0x16e   : > { %v377_v43 = vmul.f32 %v733_v42, %v372_v41 }
 0x170   : > { %v378_v44 = vsub.f32 1.0, %v377_v43 }
 0x172   : > { %v379_v47 = vmul.f32 %v378_v44, %v358_v46 }
 0x174   : > { %v380_v49 = vadd.f32 1.0, %v379_v47 }
 0x176   : > { %v381_v50 = vmul.f32 %v380_v49, %v355_v48 }
 0x178   : > { %637 = vmatmul.mubr.msk.f32.vlgmr.msra.gmra.mrb[0].mxu1 %vm397_vm3, %v381_v50 }
 0x24b   : > { %v467_v52 = vpop.f32.mrb[0].mxu1 }
 0x24c   : > { %v468_v53 = vadd.f32 %v589_v51, %v467_v52  ;;  %v638_v54 = vpop.f32.mrb[1].mxu1 }
 0x24e   : > { %471 = vst [vmem:[%s268_s28] sm:$0xff] %v468_v53 }
 0x24f   : > { %833 = shalt.err (!%p830_p2)
}
 0x250   : > { %s834_s12 = scalar_lea.hbm %s1127_s15, 128  ;;  %s838_s26 = scalar_lea.hbm %s1176_s5, 256 }
 0x251   : > { %p835_p13 = scmp.ne.s32.totalorder %s1127_s15, %s834_s12  ;;  %p839_p4 = scmp.lt.u32.totalorder %s1127_s15, %s1176_s5 }
 0x252   : > { %p840_p5 = scmp.lt.u32.totalorder %s838_s26, %s834_s12  ;;  %p842_p11 = scmp.lt.u32.totalorder %s834_s12, %s1127_s15 }
 0x253   : > { %p836_p6 = pnand %p835_p13, %p1190_p0 }
 0x254   : > { %p841_p8 = por %p840_p5, %p839_p4 }
 0x255   : > { %p837_p10 = pneg %p836_p6 }
 0x256   : > { %p843_p1 = por %p842_p11, %p841_p8 }
 0x258   : > { %p844_p3 = pnand %p843_p1, %p837_p10 }
 0x25a   : > { %847 = shalt.err (!%p844_p3)
}
 0x25b   : > { %667 = dma.vmem_to_hbm [thread:$0]  (%p1190_p0), %s1129_s7, 128, %s1127_s15, %s473_s16  }
 0x25c PF: > { %s498_s11 = sand.u32 1, %s878_s18   ;;  %p1191_p7 = scmp.ne.s32.totalorder %s1181_s25, 0 }
 0x25d   : > { %p1192_p9 = scmp.ge.s32.totalorder %s890_s21, 2  ;;  %s499_s28 = scalar_lea.sflag [#allocation4], %s498_s11 }
 0x25f   : > { %p681_p12 = pnand %p1192_p9, %p1191_p7 }
 0x261   : > { %873 = dma.done.wait (!%p681_p12), %s499_s28, 128  }
 0x262   : > { %875 = vsyncadd (!%p681_p12), %s499_s28, 4294967168  ;;  %p19_p2 = scmp.ge.s32.totalorder %s1042_s14, 4   ;;  %s1193_s18 = smov %s882_s19 }
 0x263   : > { %s1194_s19 = smov %s886_s20  ;;  %s1195_s20 = smov %s1058_s27 }
 0x264   : > { %s1196_s21 = smov %s1042_s14  ;;  %21 = sbr.rel (!%p19_p2) target bundleno = 6 (0x6), region = 93 }
 0x26b   :  { %504 = vsyncpa [#allocation3], 1 }
 0x26c   :  { %506 = vsyncpa [#allocation3 + $0x1], 1 }
 0x26d   :  { %507 = vsyncpa [#allocation6], 1 }
 0x26e   :  { %508 = vsyncpa [#allocation4], 1 }
 0x26f   :  { %510 = vsyncpa [#allocation4 + $0x1], 1 }

</bundles_post_ra>
